<compile_context>
chip_gen: v5e
topology: v5e:2x2
jax: 0.10.0
libtpu: 0.0.40
codegen_flags: <defaults>
</compile_context>

<pallas_src>
import functools

import jax
import jax.numpy as jnp
from jax import lax
from jax.experimental import pallas as pl
from jax.experimental.pallas import tpu as pltpu

IN_FEATURES = 6
OUT_FEATURES = 3


def _sigmoid(x):
    # Single EUP transcendental (tanh) + cheap scale/shift on the VALU.
    return 0.5 * jnp.tanh(0.5 * x) + 0.5


def model_kernel(w_ref, b_ref, x_ref, u_ref, *, chunk_rows):
    """w_ref: (3,6) f32 SMEM; b_ref: (3,) f32 SMEM;
    x_ref: (6, R, 128) f32 VMEM block; u_ref: (3, R, 128) f32 VMEM block."""
    tile_rows = x_ref.shape[1]
    n_chunks = tile_rows // chunk_rows

    # Hoist the 21 SMEM scalar reads out of the strip-mine loop.
    w = [[w_ref[o, k] for k in range(IN_FEATURES)] for o in range(OUT_FEATURES)]
    b = [b_ref[o] for o in range(OUT_FEATURES)]

    def body(c, carry):
        r0 = pl.multiple_of(c * chunk_rows, chunk_rows)
        rows = pl.ds(r0, chunk_rows)

        # Six dense (chunk_rows, 128) input slabs — full-vreg occupancy.
        xs = [x_ref[k, rows, :] for k in range(IN_FEATURES)]

        # Stage 1 (VPU):  h_o = sum_k W[o,k] * x_k + b_o ;  y_o = sigmoid(h_o)
        ys = []
        for o in range(OUT_FEATURES):
            acc = xs[0] * w[o][0] + b[o]
            for k in range(1, IN_FEATURES):
                acc = acc + xs[k] * w[o][k]
            ys.append(_sigmoid(acc))

        # Stage 2 (zero-pad interpretation): u_o = sum_{j<3} W[o,j] * y_j + b_o
        # y == z exactly, so u == v; computed once, returned twice by wrapper.
        for o in range(OUT_FEATURES):
            acc = ys[0] * w[o][0] + b[o]
            for j in range(1, OUT_FEATURES):
                acc = acc + ys[j] * w[o][j]
            u_ref[o, rows, :] = acc

        return carry

    lax.fori_loop(0, n_chunks, body, 0)


def model_forward(x, weight, bias, *, max_tile_rows=1024, chunk_rows=16,
                  min_kernel_batch=4096, use_kernel=None):
    """x: (N, 6) f32; weight: (3, 6) f32 (torch Linear layout); bias: (3,) f32
    -> (u, v), each (N, 3) f32 (identical arrays, see dedup note above)."""
    x = jnp.asarray(x, jnp.float32)
    weight = jnp.asarray(weight, jnp.float32)
    bias = jnp.asarray(bias, jnp.float32)
    n = x.shape[0]

    if use_kernel is None:
        use_kernel = n >= min_kernel_batch
    if not use_kernel:
        # Small-batch fast path: at the module's actual n=2 a fused XLA graph
        # beats kernel launch + 128-lane padding + transposes.
        h = _sigmoid(x @ weight.T + bias)
        u = h @ weight[:, :OUT_FEATURES].T + bias
        return u, u

    # ---- Pallas path: batch-on-lanes, (rows, 128)-dense layout ----
    rows = pl.cdiv(n, 128)                              # 128-lane columns
    tile_rows = min(max_tile_rows, ((rows + 7) // 8) * 8)  # multiple of 8
    if tile_rows % chunk_rows != 0:
        chunk_rows = 8                                  # tile_rows % 8 == 0
    chunk_rows = min(chunk_rows, tile_rows)
    rows_padded = pl.cdiv(rows, tile_rows) * tile_rows
    padded_n = rows_padded * 128

    x_t = x.T                                           # (6, N)
    if padded_n != n:
        x_t = jnp.pad(x_t, ((0, 0), (0, padded_n - n)))
    x_3d = x_t.reshape(IN_FEATURES, rows_padded, 128)   # row-major split: free

    grid = (rows_padded // tile_rows,)
    smem_spec = pl.BlockSpec(memory_space=pltpu.MemorySpace.SMEM)

    cost = pl.CostEstimate(
        flops=2 * padded_n * (IN_FEATURES + OUT_FEATURES) * OUT_FEATURES,
        transcendentals=padded_n * OUT_FEATURES,
        bytes_accessed=4 * padded_n * (IN_FEATURES + OUT_FEATURES)
        + 4 * (IN_FEATURES * OUT_FEATURES + OUT_FEATURES),
    )

    kernel = functools.partial(model_kernel, chunk_rows=chunk_rows)

    u_3d = pl.pallas_call(
        kernel,
        out_shape=jax.ShapeDtypeStruct(
            (OUT_FEATURES, rows_padded, 128), jnp.float32),
        grid=grid,
        in_specs=[
            smem_spec,                                                # W (3,6)
            smem_spec,                                                # b (3,)
            pl.BlockSpec((IN_FEATURES, tile_rows, 128), lambda i: (0, i, 0)),
        ],
        out_specs=pl.BlockSpec((OUT_FEATURES, tile_rows, 128),
                               lambda i: (0, i, 0)),
        compiler_params=pltpu.CompilerParams(
            dimension_semantics=("parallel",),      # megacore-shardable on v7x
            vmem_limit_bytes=32 * 1024 * 1024,      # explicit: same on v5e/v6e/v7x
        ),
        cost_estimate=cost,
    )(weight, bias, x_3d)

    u = u_3d.reshape(OUT_FEATURES, padded_n)[:, :n].T   # (N, 3)
    return u, u  # u == v exactly; computed once, returned twice


def reference_forward(x, weight, bias):
    """Pure-JAX reference of the same (zero-pad) interpretation."""
    h = x @ weight.T + bias
    y = jax.nn.sigmoid(h)
    z = jax.nn.sigmoid(h)
    u = y @ weight[:, :OUT_FEATURES].T + bias
    v = z @ weight[:, :OUT_FEATURES].T + bias
    return u, v


if __name__ == "__main__":
    key = jax.random.PRNGKey(0)
    kx, kw, kb, kx2 = jax.random.split(key, 4)

    # Deterministic parameter init mimicking torch.nn.Linear default
    # (uniform in +/- 1/sqrt(in_features)).
    bound = 1.0 / (IN_FEATURES ** 0.5)
    weight = jax.random.uniform(
        kw, (OUT_FEATURES, IN_FEATURES), jnp.float32, -bound, bound)
    bias = jax.random.uniform(kb, (OUT_FEATURES,), jnp.float32, -bound, bound)

    # Module's actual usage: x = torch.randn(2, 6)
    x_small = jax.random.normal(kx, (2, IN_FEATURES), jnp.float32)
    # Larger batch to exercise the tiled / strip-mined Pallas path.
    x_big = jax.random.normal(kx2, (2048, IN_FEATURES), jnp.float32)

    u_s, v_s = model_forward(x_small, weight, bias)                    # fast path
    u_k, v_k = model_forward(x_small, weight, bias, use_kernel=True)   # kernel
    u_b, v_b = model_forward(x_big, weight, bias, use_kernel=True)     # kernel
    jax.block_until_ready((u_s, v_s, u_k, v_k, u_b, v_b))

    u_ref_s, v_ref_s = reference_forward(x_small, weight, bias)
    u_ref_b, v_ref_b = reference_forward(x_big, weight, bias)

    assert u_s.shape == (2, OUT_FEATURES) and v_s.shape == (2, OUT_FEATURES)
    assert jnp.allclose(u_s, u_ref_s, atol=1e-5, rtol=1e-5)
    assert jnp.allclose(v_s, v_ref_s, atol=1e-5, rtol=1e-5)
    assert jnp.allclose(u_k, u_ref_s, atol=1e-5, rtol=1e-5)
    assert jnp.allclose(v_k, v_ref_s, atol=1e-5, rtol=1e-5)
    assert u_b.shape == (2048, OUT_FEATURES)
    assert jnp.allclose(u_b, u_ref_b, atol=1e-5, rtol=1e-5)
    assert jnp.allclose(v_b, v_ref_b, atol=1e-5, rtol=1e-5)

    print("KERNEL_OK")
</pallas_src>

<mosaic_0001>
module attributes {stable_mosaic.version = 11 : i64} {
  func.func @model_kernel(%arg0: i32, %arg1: memref<3x6xf32, #tpu.memory_space<smem>>, %arg2: memref<3xf32, #tpu.memory_space<smem>>, %arg3: memref<6x8x128xf32, #tpu.memory_space<vmem>>, %arg4: memref<3x8x128xf32, #tpu.memory_space<vmem>>) attributes {dimension_semantics = [#tpu.dimension_semantics<parallel>], iteration_bounds = array<i64: 1>, scalar_prefetch = 0 : i64, scratch_operands = 0 : i64, tpu.core_type = #tpu.core_type<tc>, window_params = [{transform_indices = @transform_0, window_bounds = array<i64: 3, 6>}, {transform_indices = @transform_1, window_bounds = array<i64: 3>}, {transform_indices = @transform_2, window_bounds = array<i64: 6, 8, 128>}, {transform_indices = @transform_3, window_bounds = array<i64: 3, 8, 128>}]} {
    %c0 = arith.constant 0 : index
    %c0_0 = arith.constant 0 : index
    %0 = memref.load %arg1[%c0, %c0_0] : memref<3x6xf32, #tpu.memory_space<smem>>
    %c0_1 = arith.constant 0 : index
    %c1 = arith.constant 1 : index
    %1 = memref.load %arg1[%c0_1, %c1] : memref<3x6xf32, #tpu.memory_space<smem>>
    %c0_2 = arith.constant 0 : index
    %c2 = arith.constant 2 : index
    %2 = memref.load %arg1[%c0_2, %c2] : memref<3x6xf32, #tpu.memory_space<smem>>
    %c0_3 = arith.constant 0 : index
    %c3 = arith.constant 3 : index
    %3 = memref.load %arg1[%c0_3, %c3] : memref<3x6xf32, #tpu.memory_space<smem>>
    %c0_4 = arith.constant 0 : index
    %c4 = arith.constant 4 : index
    %4 = memref.load %arg1[%c0_4, %c4] : memref<3x6xf32, #tpu.memory_space<smem>>
    %c0_5 = arith.constant 0 : index
    %c5 = arith.constant 5 : index
    %5 = memref.load %arg1[%c0_5, %c5] : memref<3x6xf32, #tpu.memory_space<smem>>
    %c1_6 = arith.constant 1 : index
    %c0_7 = arith.constant 0 : index
    %6 = memref.load %arg1[%c1_6, %c0_7] : memref<3x6xf32, #tpu.memory_space<smem>>
    %c1_8 = arith.constant 1 : index
    %c1_9 = arith.constant 1 : index
    %7 = memref.load %arg1[%c1_8, %c1_9] : memref<3x6xf32, #tpu.memory_space<smem>>
    %c1_10 = arith.constant 1 : index
    %c2_11 = arith.constant 2 : index
    %8 = memref.load %arg1[%c1_10, %c2_11] : memref<3x6xf32, #tpu.memory_space<smem>>
    %c1_12 = arith.constant 1 : index
    %c3_13 = arith.constant 3 : index
    %9 = memref.load %arg1[%c1_12, %c3_13] : memref<3x6xf32, #tpu.memory_space<smem>>
    %c1_14 = arith.constant 1 : index
    %c4_15 = arith.constant 4 : index
    %10 = memref.load %arg1[%c1_14, %c4_15] : memref<3x6xf32, #tpu.memory_space<smem>>
    %c1_16 = arith.constant 1 : index
    %c5_17 = arith.constant 5 : index
    %11 = memref.load %arg1[%c1_16, %c5_17] : memref<3x6xf32, #tpu.memory_space<smem>>
    %c2_18 = arith.constant 2 : index
    %c0_19 = arith.constant 0 : index
    %12 = memref.load %arg1[%c2_18, %c0_19] : memref<3x6xf32, #tpu.memory_space<smem>>
    %c2_20 = arith.constant 2 : index
    %c1_21 = arith.constant 1 : index
    %13 = memref.load %arg1[%c2_20, %c1_21] : memref<3x6xf32, #tpu.memory_space<smem>>
    %c2_22 = arith.constant 2 : index
    %c2_23 = arith.constant 2 : index
    %14 = memref.load %arg1[%c2_22, %c2_23] : memref<3x6xf32, #tpu.memory_space<smem>>
    %c2_24 = arith.constant 2 : index
    %c3_25 = arith.constant 3 : index
    %15 = memref.load %arg1[%c2_24, %c3_25] : memref<3x6xf32, #tpu.memory_space<smem>>
    %c2_26 = arith.constant 2 : index
    %c4_27 = arith.constant 4 : index
    %16 = memref.load %arg1[%c2_26, %c4_27] : memref<3x6xf32, #tpu.memory_space<smem>>
    %c2_28 = arith.constant 2 : index
    %c5_29 = arith.constant 5 : index
    %17 = memref.load %arg1[%c2_28, %c5_29] : memref<3x6xf32, #tpu.memory_space<smem>>
    %c0_30 = arith.constant 0 : index
    %18 = memref.load %arg2[%c0_30] : memref<3xf32, #tpu.memory_space<smem>>
    %c1_31 = arith.constant 1 : index
    %19 = memref.load %arg2[%c1_31] : memref<3xf32, #tpu.memory_space<smem>>
    %c2_32 = arith.constant 2 : index
    %20 = memref.load %arg2[%c2_32] : memref<3xf32, #tpu.memory_space<smem>>
    %c0_i32 = arith.constant 0 : i32
    %c8_i32 = arith.constant 8 : i32
    %21 = arith.muli %c0_i32, %c8_i32 : i32
    %22 = tpu.assume_multiple %21, 8 : i32
    %c0_33 = arith.constant 0 : index
    %23 = arith.index_cast %22 : i32 to index
    %c0_34 = arith.constant 0 : index
    %24 = vector.load %arg3[%c0_33, %23, %c0_34] : memref<6x8x128xf32, #tpu.memory_space<vmem>>, vector<1x8x128xf32>
    %25 = vector.shape_cast %24 : vector<1x8x128xf32> to vector<8x128xf32>
    %c1_35 = arith.constant 1 : index
    %26 = arith.index_cast %22 : i32 to index
    %c0_36 = arith.constant 0 : index
    %27 = vector.load %arg3[%c1_35, %26, %c0_36] : memref<6x8x128xf32, #tpu.memory_space<vmem>>, vector<1x8x128xf32>
    %28 = vector.shape_cast %27 : vector<1x8x128xf32> to vector<8x128xf32>
    %c2_37 = arith.constant 2 : index
    %29 = arith.index_cast %22 : i32 to index
    %c0_38 = arith.constant 0 : index
    %30 = vector.load %arg3[%c2_37, %29, %c0_38] : memref<6x8x128xf32, #tpu.memory_space<vmem>>, vector<1x8x128xf32>
    %31 = vector.shape_cast %30 : vector<1x8x128xf32> to vector<8x128xf32>
    %c3_39 = arith.constant 3 : index
    %32 = arith.index_cast %22 : i32 to index
    %c0_40 = arith.constant 0 : index
    %33 = vector.load %arg3[%c3_39, %32, %c0_40] : memref<6x8x128xf32, #tpu.memory_space<vmem>>, vector<1x8x128xf32>
    %34 = vector.shape_cast %33 : vector<1x8x128xf32> to vector<8x128xf32>
    %c4_41 = arith.constant 4 : index
    %35 = arith.index_cast %22 : i32 to index
    %c0_42 = arith.constant 0 : index
    %36 = vector.load %arg3[%c4_41, %35, %c0_42] : memref<6x8x128xf32, #tpu.memory_space<vmem>>, vector<1x8x128xf32>
    %37 = vector.shape_cast %36 : vector<1x8x128xf32> to vector<8x128xf32>
    %c5_43 = arith.constant 5 : index
    %38 = arith.index_cast %22 : i32 to index
    %c0_44 = arith.constant 0 : index
    %39 = vector.load %arg3[%c5_43, %38, %c0_44] : memref<6x8x128xf32, #tpu.memory_space<vmem>>, vector<1x8x128xf32>
    %40 = vector.shape_cast %39 : vector<1x8x128xf32> to vector<8x128xf32>
    %41 = vector.broadcast %0 : f32 to vector<8x128xf32>
    %42 = arith.mulf %25, %41 : vector<8x128xf32>
    %43 = vector.broadcast %18 : f32 to vector<8x128xf32>
    %44 = arith.addf %42, %43 : vector<8x128xf32>
    %45 = vector.broadcast %1 : f32 to vector<8x128xf32>
    %46 = arith.mulf %28, %45 : vector<8x128xf32>
    %47 = arith.addf %44, %46 : vector<8x128xf32>
    %48 = vector.broadcast %2 : f32 to vector<8x128xf32>
    %49 = arith.mulf %31, %48 : vector<8x128xf32>
    %50 = arith.addf %47, %49 : vector<8x128xf32>
    %51 = vector.broadcast %3 : f32 to vector<8x128xf32>
    %52 = arith.mulf %34, %51 : vector<8x128xf32>
    %53 = arith.addf %50, %52 : vector<8x128xf32>
    %54 = vector.broadcast %4 : f32 to vector<8x128xf32>
    %55 = arith.mulf %37, %54 : vector<8x128xf32>
    %56 = arith.addf %53, %55 : vector<8x128xf32>
    %57 = vector.broadcast %5 : f32 to vector<8x128xf32>
    %58 = arith.mulf %40, %57 : vector<8x128xf32>
    %59 = arith.addf %56, %58 : vector<8x128xf32>
    %cst = arith.constant 5.000000e-01 : f32
    %60 = vector.broadcast %cst : f32 to vector<8x128xf32>
    %61 = arith.mulf %60, %59 : vector<8x128xf32>
    %62 = math.tanh %61 : vector<8x128xf32>
    %cst_45 = arith.constant 5.000000e-01 : f32
    %63 = vector.broadcast %cst_45 : f32 to vector<8x128xf32>
    %64 = arith.mulf %63, %62 : vector<8x128xf32>
    %cst_46 = arith.constant 5.000000e-01 : f32
    %65 = vector.broadcast %cst_46 : f32 to vector<8x128xf32>
    %66 = arith.addf %64, %65 : vector<8x128xf32>
    %67 = vector.broadcast %6 : f32 to vector<8x128xf32>
    %68 = arith.mulf %25, %67 : vector<8x128xf32>
    %69 = vector.broadcast %19 : f32 to vector<8x128xf32>
    %70 = arith.addf %68, %69 : vector<8x128xf32>
    %71 = vector.broadcast %7 : f32 to vector<8x128xf32>
    %72 = arith.mulf %28, %71 : vector<8x128xf32>
    %73 = arith.addf %70, %72 : vector<8x128xf32>
    %74 = vector.broadcast %8 : f32 to vector<8x128xf32>
    %75 = arith.mulf %31, %74 : vector<8x128xf32>
    %76 = arith.addf %73, %75 : vector<8x128xf32>
    %77 = vector.broadcast %9 : f32 to vector<8x128xf32>
    %78 = arith.mulf %34, %77 : vector<8x128xf32>
    %79 = arith.addf %76, %78 : vector<8x128xf32>
    %80 = vector.broadcast %10 : f32 to vector<8x128xf32>
    %81 = arith.mulf %37, %80 : vector<8x128xf32>
    %82 = arith.addf %79, %81 : vector<8x128xf32>
    %83 = vector.broadcast %11 : f32 to vector<8x128xf32>
    %84 = arith.mulf %40, %83 : vector<8x128xf32>
    %85 = arith.addf %82, %84 : vector<8x128xf32>
    %cst_47 = arith.constant 5.000000e-01 : f32
    %86 = vector.broadcast %cst_47 : f32 to vector<8x128xf32>
    %87 = arith.mulf %86, %85 : vector<8x128xf32>
    %88 = math.tanh %87 : vector<8x128xf32>
    %cst_48 = arith.constant 5.000000e-01 : f32
    %89 = vector.broadcast %cst_48 : f32 to vector<8x128xf32>
    %90 = arith.mulf %89, %88 : vector<8x128xf32>
    %cst_49 = arith.constant 5.000000e-01 : f32
    %91 = vector.broadcast %cst_49 : f32 to vector<8x128xf32>
    %92 = arith.addf %90, %91 : vector<8x128xf32>
    %93 = vector.broadcast %12 : f32 to vector<8x128xf32>
    %94 = arith.mulf %25, %93 : vector<8x128xf32>
    %95 = vector.broadcast %20 : f32 to vector<8x128xf32>
    %96 = arith.addf %94, %95 : vector<8x128xf32>
    %97 = vector.broadcast %13 : f32 to vector<8x128xf32>
    %98 = arith.mulf %28, %97 : vector<8x128xf32>
    %99 = arith.addf %96, %98 : vector<8x128xf32>
    %100 = vector.broadcast %14 : f32 to vector<8x128xf32>
    %101 = arith.mulf %31, %100 : vector<8x128xf32>
    %102 = arith.addf %99, %101 : vector<8x128xf32>
    %103 = vector.broadcast %15 : f32 to vector<8x128xf32>
    %104 = arith.mulf %34, %103 : vector<8x128xf32>
    %105 = arith.addf %102, %104 : vector<8x128xf32>
    %106 = vector.broadcast %16 : f32 to vector<8x128xf32>
    %107 = arith.mulf %37, %106 : vector<8x128xf32>
    %108 = arith.addf %105, %107 : vector<8x128xf32>
    %109 = vector.broadcast %17 : f32 to vector<8x128xf32>
    %110 = arith.mulf %40, %109 : vector<8x128xf32>
    %111 = arith.addf %108, %110 : vector<8x128xf32>
    %cst_50 = arith.constant 5.000000e-01 : f32
    %112 = vector.broadcast %cst_50 : f32 to vector<8x128xf32>
    %113 = arith.mulf %112, %111 : vector<8x128xf32>
    %114 = math.tanh %113 : vector<8x128xf32>
    %cst_51 = arith.constant 5.000000e-01 : f32
    %115 = vector.broadcast %cst_51 : f32 to vector<8x128xf32>
    %116 = arith.mulf %115, %114 : vector<8x128xf32>
    %cst_52 = arith.constant 5.000000e-01 : f32
    %117 = vector.broadcast %cst_52 : f32 to vector<8x128xf32>
    %118 = arith.addf %116, %117 : vector<8x128xf32>
    %119 = vector.broadcast %0 : f32 to vector<8x128xf32>
    %120 = arith.mulf %66, %119 : vector<8x128xf32>
    %121 = vector.broadcast %18 : f32 to vector<8x128xf32>
    %122 = arith.addf %120, %121 : vector<8x128xf32>
    %123 = vector.broadcast %1 : f32 to vector<8x128xf32>
    %124 = arith.mulf %92, %123 : vector<8x128xf32>
    %125 = arith.addf %122, %124 : vector<8x128xf32>
    %126 = vector.broadcast %2 : f32 to vector<8x128xf32>
    %127 = arith.mulf %118, %126 : vector<8x128xf32>
    %128 = arith.addf %125, %127 : vector<8x128xf32>
    %c0_53 = arith.constant 0 : index
    %129 = arith.index_cast %22 : i32 to index
    %c0_54 = arith.constant 0 : index
    %130 = vector.load %arg4[%c0_53, %129, %c0_54] : memref<3x8x128xf32, #tpu.memory_space<vmem>>, vector<1x8x128xf32>
    %131 = vector.shape_cast %130 : vector<1x8x128xf32> to vector<8x128xf32>
    %132 = vector.shape_cast %128 : vector<8x128xf32> to vector<1x8x128xf32>
    tpu.vector_store %arg4[%c0_53, %129, %c0_54], %132 {strides = array<i32>} : memref<3x8x128xf32, #tpu.memory_space<vmem>>, vector<1x8x128xf32>,
    %133 = vector.broadcast %6 : f32 to vector<8x128xf32>
    %134 = arith.mulf %66, %133 : vector<8x128xf32>
    %135 = vector.broadcast %19 : f32 to vector<8x128xf32>
    %136 = arith.addf %134, %135 : vector<8x128xf32>
    %137 = vector.broadcast %7 : f32 to vector<8x128xf32>
    %138 = arith.mulf %92, %137 : vector<8x128xf32>
    %139 = arith.addf %136, %138 : vector<8x128xf32>
    %140 = vector.broadcast %8 : f32 to vector<8x128xf32>
    %141 = arith.mulf %118, %140 : vector<8x128xf32>
    %142 = arith.addf %139, %141 : vector<8x128xf32>
    %c1_55 = arith.constant 1 : index
    %143 = arith.index_cast %22 : i32 to index
    %c0_56 = arith.constant 0 : index
    %144 = vector.load %arg4[%c1_55, %143, %c0_56] : memref<3x8x128xf32, #tpu.memory_space<vmem>>, vector<1x8x128xf32>
    %145 = vector.shape_cast %144 : vector<1x8x128xf32> to vector<8x128xf32>
    %146 = vector.shape_cast %142 : vector<8x128xf32> to vector<1x8x128xf32>
    tpu.vector_store %arg4[%c1_55, %143, %c0_56], %146 {strides = array<i32>} : memref<3x8x128xf32, #tpu.memory_space<vmem>>, vector<1x8x128xf32>,
    %147 = vector.broadcast %12 : f32 to vector<8x128xf32>
    %148 = arith.mulf %66, %147 : vector<8x128xf32>
    %149 = vector.broadcast %20 : f32 to vector<8x128xf32>
    %150 = arith.addf %148, %149 : vector<8x128xf32>
    %151 = vector.broadcast %13 : f32 to vector<8x128xf32>
    %152 = arith.mulf %92, %151 : vector<8x128xf32>
    %153 = arith.addf %150, %152 : vector<8x128xf32>
    %154 = vector.broadcast %14 : f32 to vector<8x128xf32>
    %155 = arith.mulf %118, %154 : vector<8x128xf32>
    %156 = arith.addf %153, %155 : vector<8x128xf32>
    %c2_57 = arith.constant 2 : index
    %157 = arith.index_cast %22 : i32 to index
    %c0_58 = arith.constant 0 : index
    %158 = vector.load %arg4[%c2_57, %157, %c0_58] : memref<3x8x128xf32, #tpu.memory_space<vmem>>, vector<1x8x128xf32>
    %159 = vector.shape_cast %158 : vector<1x8x128xf32> to vector<8x128xf32>
    %160 = vector.shape_cast %156 : vector<8x128xf32> to vector<1x8x128xf32>
    tpu.vector_store %arg4[%c2_57, %157, %c0_58], %160 {strides = array<i32>} : memref<3x8x128xf32, #tpu.memory_space<vmem>>, vector<1x8x128xf32>,
    %c1_i32 = arith.constant 1 : i32
    return
  }
  func.func @transform_0(%arg0: i32) -> (i32, i32) {
    %c0_i32 = arith.constant 0 : i32
    %c0_i32_0 = arith.constant 0 : i32
    %c0_i32_1 = arith.constant 0 : i32
    return %c0_i32, %c0_i32_0 : i32, i32
  }
  func.func @transform_1(%arg0: i32) -> i32 {
    %c0_i32 = arith.constant 0 : i32
    %c0_i32_0 = arith.constant 0 : i32
    return %c0_i32 : i32
  }
  func.func @transform_2(%arg0: i32) -> (i32, i32, i32) {
    %c0_i32 = arith.constant 0 : i32
    %c0_i32_0 = arith.constant 0 : i32
    %c0_i32_1 = arith.constant 0 : i32
    return %c0_i32, %arg0, %c0_i32_0 : i32, i32, i32
  }
  func.func @transform_3(%arg0: i32) -> (i32, i32, i32) {
    %c0_i32 = arith.constant 0 : i32
    %c0_i32_0 = arith.constant 0 : i32
    %c0_i32_1 = arith.constant 0 : i32
    return %c0_i32, %arg0, %c0_i32_0 : i32, i32, i32
  }
}

</mosaic_0001>

<bundles_post_ra>
// kernel: tpu_custom_call.1
= control target key start
LH: loop header
LB: loop body
LE: loop exit
PB: predicated region body
PF: predicated region fallthrough
CT: control target
= control target key end

     0   :  { %8 = vsyncpa [#allocation5], 0  ;;  %s471_s0 = inlined_call_operand.hbm [shape: f32[3,6], index: 0, kind: input, shape index: {}]   ;;  %s472_s1 = inlined_call_operand.hbm [shape: f32[3], index: 1, kind: input, shape index: {}]   ;;  %s473_s2 = inlined_call_operand.hbm [shape: f32[6,8,128], index: 2, kind: input, shape index: {}]   ;;  %s474_s3 = inlined_call_operand.hbm [shape: f32[3,8,128], index: 3, kind: output, shape index: {}]  }
   0x1   :  { %9 = vsyncpa [#allocation7], 0 }
   0x2   :  { %10 = vsyncpa [#allocation3], 0 }
   0x3   :  { %11 = vsyncpa [#allocation4], 0  ;;  %s17_s14 = sshll.u32 %s471_s0, 4  ;;  %s26_s17 = sshll.u32 %s472_s1, 4  ;;  %s18_s14 = int_to_ptr.hbm [resolvable:$true] %s17_s14  ;;  %s27_s17 = int_to_ptr.hbm [resolvable:$true] %s26_s17 }
   0x4   :  { %s324_s18 = smov [#allocation2]   ;;  %s325_s19 = smov [#allocation6]  }
   0x5   :  { %20 = dma.hbm_to_smem %s18_s14, 64, %s324_s18, [#allocation5]  }
   0x6   :  { %29 = dma.hbm_to_smem %s27_s17, 16, %s325_s19, [#allocation7]  }
   0x7   :  { %s34_s22 = sshll.u32 %s473_s2, 4  ;;  %s326_s23 = smov [#allocation8]   ;;  %s35_s22 = int_to_ptr.hbm [resolvable:$true] %s34_s22 }
   0x8   :  { %s36_s24 = sshll.u32 %s326_s23, 4  ;;  %s327_s25 = smov 128   ;;  %s37_s24 = int_to_ptr.vmem [resolvable:$true] %s36_s24 }
   0x9   :  { %s328_s0 = smov 8  }
   0xa   :  { %42 = dma.hbm_to_vmem [thread:$0]  %s35_s22, 768, %s37_s24, [#allocation3], %s327_s25, %s327_s25, %s328_s0  }
   0xb   :  { %316 = dma.done.wait [#allocation5], 64  }
   0xc   :  { %317 = vsyncadd [#allocation5], 4294967232 }
   0xd   :  { %318 = dma.done.wait [#allocation7], 16  }
   0xe   :  { %319 = vsyncadd [#allocation7], 4294967280 }
   0xf   :  { %320 = dma.done.wait [#allocation3], 768  }
  0x10   :  { %321 = vsyncadd [#allocation3], 4294966528 }
  0x11   :  { %55 = sfence }
  0x12   :  { %s362_s1 = sld [smem:[#allocation2]]  ;;  %v77_v0 = vld [vmem:[#allocation8] sm:$0xff]  ;;  %v80_v2 = vld [vmem:[#allocation8 + $0x8] sm:$0xff]  ;;  %v83_v5 = vld [vmem:[#allocation8 + $0x10] sm:$0xff]  ;;  %s329_s18 = smov [#allocation9]  }
  0x13   :  { %s364_s2 = sld [smem:[#allocation2 + $0x1]]  ;;  %v86_v6 = vld [vmem:[#allocation8 + $0x18] sm:$0xff]  ;;  %v89_v10 = vld [vmem:[#allocation8 + $0x20] sm:$0xff]  ;;  %v92_v37 = vld [vmem:[#allocation8 + $0x28] sm:$0xff]  ;;  %s189_s19 = sshll.u32 %s329_s18, 4  ;;  %s190_s19 = int_to_ptr.vmem [resolvable:$true] %s189_s19 }
  0x14   :  { %s366_s26 = sld [smem:[#allocation2 + $0x2]]  ;;  %s191_s22 = sshll.u32 %s474_s3, 4  ;;  %s192_s22 = int_to_ptr.hbm [resolvable:$true] %s191_s22 }
  0x15   :  { %s368_s27 = sld [smem:[#allocation2 + $0x3]] }
  0x16   :  { %s370_s28 = sld [smem:[#allocation2 + $0x4]] }
  0x17   :  { %s372_s29 = sld [smem:[#allocation2 + $0x5]] }
  0x18   :  { %s374_s30 = sld [smem:[#allocation2 + $0x80]]  ;;  %v93_v1 = vstv %s362_s1 }
  0x19   :  { %s376_s4 = sld [smem:[#allocation2 + $0x81]]  ;;  %v97_v3 = vstv %s364_s2  ;;  %v94_v11 = vmul.f32 %v93_v1, %v77_v0 }
  0x1a   :  { %s378_s5 = sld [smem:[#allocation2 + $0x82]]  ;;  %v100_v7 = vstv %s366_s26  ;;  %v98_v14 = vmul.f32 %v97_v3, %v80_v2 }
  0x1b   :  { %s380_s6 = sld [smem:[#allocation2 + $0x83]]  ;;  %v103_v8 = vstv %s368_s27  ;;  %v101_v17 = vmul.f32 %v100_v7, %v83_v5 }
  0x1c   :  { %s382_s7 = sld [smem:[#allocation2 + $0x100]]  ;;  %v106_v12 = vstv %s370_s28  ;;  %v104_v18 = vmul.f32 %v103_v8, %v86_v6 }
  0x1d   :  { %s384_s8 = sld [smem:[#allocation2 + $0x84]]  ;;  %v107_v22 = vmul.f32 %v106_v12, %v89_v10  ;;  %v109_v38 = vstv %s372_s29 }
  0x1e   :  { %s386_s9 = sld [smem:[#allocation2 + $0x101]]  ;;  %v116_v4 = vstv %s374_s30  ;;  %v110_v50 = vmul.f32 %v109_v38, %v92_v37 }
  0x1f   :  { %s388_s10 = sld [smem:[#allocation2 + $0x102]]  ;;  %v120_v13 = vstv %s376_s4  ;;  %v117_v15 = vmul.f32 %v116_v4, %v77_v0 }
  0x20   :  { %s390_s11 = sld [smem:[#allocation2 + $0x103]]  ;;  %v123_v19 = vstv %s378_s5  ;;  %v121_v23 = vmul.f32 %v120_v13, %v80_v2 }
  0x21   :  { %s392_s12 = sld [smem:[#allocation2 + $0x104]]  ;;  %v126_v27 = vstv %s380_s6  ;;  %v124_v30 = vmul.f32 %v123_v19, %v83_v5 }
  0x22   :  { %s394_s13 = sld [smem:[#allocation6]]  ;;  %v139_v9 = vstv %s382_s7  ;;  %v127_v40 = vmul.f32 %v126_v27, %v86_v6 }
  0x23   :  { %s397_s14 = sld [smem:[#allocation6 + $0x1]]  ;;  %v140_v20 = vmul.f32 %v139_v9, %v77_v0  ;;  %v129_v34 = vstv %s384_s8 }
  0x24   :  { %s401_s15 = sld [smem:[#allocation6 + $0x2]]  ;;  %v143_v16 = vstv %s386_s9  ;;  %v130_v47 = vmul.f32 %v129_v34, %v89_v10 }
  0x25   :  { %s406_s16 = sld [smem:[#allocation2 + $0x85]]  ;;  %v146_v24 = vstv %s388_s10  ;;  %v144_v28 = vmul.f32 %v143_v16, %v80_v2 }
  0x26   :  { %s412_s17 = sld [smem:[#allocation2 + $0x105]]  ;;  %v149_v32 = vstv %s390_s11  ;;  %v147_v36 = vmul.f32 %v146_v24, %v83_v5 }
  0x27   :  { %v152_v41 = vstv %s392_s12  ;;  %v150_v45 = vmul.f32 %v149_v32, %v86_v6 }
  0x28   :  { %v95_v21 = vstv %s394_s13  ;;  %v153_v52 = vmul.f32 %v152_v41, %v89_v10 }
  0x29   :  { %v96_v25 = vadd.f32 %v95_v21, %v94_v11  ;;  %v118_v26 = vstv %s397_s14 }
  0x2a   :  { %v119_v29 = vadd.f32 %v118_v26, %v117_v15  ;;  %v141_v31 = vstv %s401_s15 }
  0x2b   :  { %v99_v33 = vadd.f32 %v98_v14, %v96_v25  ;;  %v142_v35 = vadd.f32 %v141_v31, %v140_v20  ;;  %v132_v43 = vstv %s406_s16 }
  0x2c   :  { %v122_v39 = vadd.f32 %v121_v23, %v119_v29  ;;  %v155_v48 = vstv %s412_s17  ;;  %v133_v54 = vmul.f32 %v132_v43, %v92_v37 }
  0x2d   :  { %v102_v42 = vadd.f32 %v101_v17, %v99_v33  ;;  %v145_v44 = vadd.f32 %v144_v28, %v142_v35  ;;  %v156_v57 = vmul.f32 %v155_v48, %v92_v37 }
  0x2e   :  { %v125_v46 = vadd.f32 %v124_v30, %v122_v39 }
  0x2f   :  { %v105_v49 = vadd.f32 %v104_v18, %v102_v42  ;;  %v148_v51 = vadd.f32 %v147_v36, %v145_v44 }
  0x30   :  { %v128_v53 = vadd.f32 %v127_v40, %v125_v46 }
  0x31   :  { %v108_v55 = vadd.f32 %v107_v22, %v105_v49  ;;  %v151_v56 = vadd.f32 %v150_v45, %v148_v51 }
  0x32   :  { %v131_v58 = vadd.f32 %v130_v47, %v128_v53 }
  0x33   :  { %v111_v59 = vadd.f32 %v110_v50, %v108_v55  ;;  %v154_v60 = vadd.f32 %v153_v52, %v151_v56 }
  0x34   :  { %v134_v61 = vadd.f32 %v133_v54, %v131_v58 }
  0x35   :  { %v112_v62 = vmul.f32 0.5, %v111_v59  ;;  %v157_v63 = vadd.f32 %v156_v57, %v154_v60 }
  0x36   :  { %v135_v0 = vmul.f32 0.5, %v134_v61 }
  0x37   :  { %238 = vtanh.f32 %v112_v62  ;;  %v158_v2 = vmul.f32 0.5, %v157_v63 }
  0x38   :  { %240 = vtanh.f32 %v135_v0 }
  0x39   :  { %242 = vtanh.f32 %v158_v2 }
  0x3d   :  { %v239_v5 = vpop.eup %238 }
  0x3e   :  { %v241_v6 = vpop.eup %240  ;;  %v114_v8 = vmul.f32 0.5, %v239_v5 }
  0x3f   :  { %v243_v10 = vpop.eup %242  ;;  %v137_v11 = vmul.f32 0.5, %v241_v6 }
  0x40   :  { %v115_v12 = vadd.f32 0.5, %v114_v8  ;;  %v160_v14 = vmul.f32 0.5, %v243_v10 }
  0x41   :  { %v138_v15 = vadd.f32 0.5, %v137_v11 }
  0x42   :  { %v161_v17 = vadd.f32 0.5, %v160_v14  ;;  %v162_v18 = vmul.f32 %v115_v12, %v93_v1  ;;  %v169_v20 = vmul.f32 %v116_v4, %v115_v12  ;;  %v177_v22 = vmul.f32 %v139_v9, %v115_v12 }
  0x43   :  { %v164_v23 = vmul.f32 %v138_v15, %v97_v3  ;;  %v171_v25 = vmul.f32 %v138_v15, %v120_v13  ;;  %v179_v27 = vmul.f32 %v143_v16, %v138_v15 }
  0x44   :  { %v163_v28 = vadd.f32 %v162_v18, %v95_v21  ;;  %v166_v29 = vmul.f32 %v161_v17, %v100_v7  ;;  %v170_v30 = vadd.f32 %v169_v20, %v118_v26  ;;  %v173_v32 = vmul.f32 %v161_v17, %v123_v19 }
  0x45   :  { %v178_v33 = vadd.f32 %v177_v22, %v141_v31  ;;  %v181_v1 = vmul.f32 %v161_v17, %v146_v24 }
  0x46   :  { %v165_v34 = vadd.f32 %v164_v23, %v163_v28  ;;  %v172_v4 = vadd.f32 %v171_v25, %v170_v30 }
  0x47   :  { %v180_v35 = vadd.f32 %v179_v27, %v178_v33 }
  0x48   :  { %v167_v3 = vadd.f32 %v166_v29, %v165_v34  ;;  %v174_v9 = vadd.f32 %v173_v32, %v172_v4 }
  0x49   :  { %v182_v13 = vadd.f32 %v181_v1, %v180_v35 }
  0x4a   :  { %168 = vst [vmem:[#allocation9] sm:$0xff] %v167_v3 }
  0x4b   :  { %176 = vst [vmem:[#allocation9 + $0x8] sm:$0xff] %v174_v9 }
  0x4c   :  { %184 = vst [vmem:[#allocation9 + $0x10] sm:$0xff] %v182_v13 }
  0x4d   :  { %197 = dma.vmem_to_hbm [thread:$0]  %s190_s19, 384, %s192_s22, [#allocation4], %s327_s25, %s327_s25, %s328_s0  }
  0x4e   :  { %322 = dma.done.wait [#allocation4], 384  }
  0x4f   :  { %323 = vsyncadd [#allocation4], 4294966912 }
  0x50   :  { %202 = vsyncpa [#allocation3], 1 }
  0x51   :  { %203 = vsyncpa [#allocation4], 1 }
  0x52   :  { %204 = vsyncpa [#allocation5], 1 }
  0x53   :  { %205 = vsyncpa [#allocation7], 1 }

</bundles_post_ra>
